<compile_context>
chip_gen: v5e
topology: v5e:2x2
jax: 0.10.0
libtpu: 0.0.40
codegen_flags: <defaults>
</compile_context>

<pallas_src>
import functools

import jax
import jax.numpy as jnp
import numpy as np
from jax.experimental import pallas as pl
from jax.experimental.pallas import tpu as pltpu

DEFAULT_TEMPERATURE = 0.5


def _consistency_kl_kernel(p1_ref, p2_ref, out_ref, *, inv_temperature):
    s = pl.program_id(1)

    @pl.when(s == 0)
    def _init():
        out_ref[...] = jnp.zeros_like(out_ref)

    # Block view is (1, C, S, 8, 128); drop the leading batch dim -> (C, S, 8, 128).
    # Channel axis leads, so all channel reductions below are elementwise VALU ops.
    x1 = p1_ref[0].astype(jnp.float32) * inv_temperature
    x2 = p2_ref[0].astype(jnp.float32) * inv_temperature

    # Stable softmax statistics per pixel (shape (1, S, 8, 128) rows).
    m1 = jnp.max(x1, axis=0, keepdims=True)
    e1 = jnp.exp(x1 - m1)
    z1 = jnp.sum(e1, axis=0, keepdims=True)

    m2 = jnp.max(x2, axis=0, keepdims=True)
    e2 = jnp.exp(x2 - m2)
    z2 = jnp.sum(e2, axis=0, keepdims=True)

    # Probabilities via approx reciprocal (EUP slot); per-pixel rows only.
    pr1 = e1 * pl.reciprocal(z1, approx=True)
    pr2 = e2 * pl.reciprocal(z2, approx=True)

    # Symmetric KL fused:  kl(p2||p1) + kl(p1||p2) == sum((pr1 - pr2) * (ls1 - ls2)),
    # with ls1 - ls2 = (x1 - x2) - ((m1 + log z1) - (m2 + log z2))  (no ls temporaries).
    d = (x1 - x2) - ((m1 + jnp.log(z1)) - (m2 + jnp.log(z2)))

    # Reduce over channels, then over slab groups -> a single (8, 128) vreg RMW.
    contrib = jnp.sum((pr1 - pr2) * d, axis=0)              # (S, 8, 128), VALU adds
    out_ref[...] += jnp.sum(contrib, axis=0, keepdims=True)  # (1, 8, 128)


def _choose_rows_per_chunk(c, rows_needed):
    """Rows (of 128 lanes) per spatial chunk: multiple of 8, ~512 KiB f32 per block
    (halved on <=64 MiB-VMEM chips, i.e. v7x), never larger than the data needs."""
    budget = 512 * 1024  # f32-equivalent bytes per input block
    try:
        info = pltpu.get_tpu_info()
        if getattr(info, "vmem_capacity_bytes", 128 << 20) <= (64 << 20):
            budget //= 2
    except Exception:
        pass
    max_rows = max(8, (budget // (c * 128 * 4)) // 8 * 8)
    need = max(8, ((rows_needed + 7) // 8) * 8)
    return min(max_rows, need)


def consistency_loss(pred1, pred2, temperature=DEFAULT_TEMPERATURE):
    """pred1, pred2: (B, C, H, W) logits (f32 or bf16). Returns scalar loss matching
    ConsistencyLoss.forward (symmetric KL over channel softmax, batchmean, /2)."""
    assert pred1.shape == pred2.shape, "predictions must share a shape"
    b, c, h, w = pred1.shape
    hw = h * w

    rows = -(-hw // 128)                     # ceil(hw / 128) 128-lane rows
    rpc = _choose_rows_per_chunk(c, rows)    # rows per spatial chunk (multiple of 8)
    n_chunks = -(-rows // rpc)
    rows_pad = n_chunks * rpc
    hw_pad = rows_pad * 128
    sub = rpc // 8                           # (8, 128) slabs per chunk

    def _prep(x):
        x = x.reshape(b, c, hw)              # keep native dtype on the wire
        if hw_pad != hw:
            # Zero-padded pixels get identical logits on both sides -> exact 0 loss.
            x = jnp.pad(x, ((0, 0), (0, 0), (0, hw_pad - hw)))
        return x.reshape(b, c, rows_pad // 8, 8, 128)

    p1, p2 = _prep(pred1), _prep(pred2)

    in_spec = pl.BlockSpec((1, c, sub, 8, 128), lambda i, s: (i, 0, s, 0, 0))
    out_spec = pl.BlockSpec((1, 8, 128), lambda i, s: (i, 0, 0))

    # Size the VMEM limit from the real working set: 2 inputs x 2 pipeline buffers in
    # the input dtype plus ~a dozen block-sized f32 temporaries plus the accumulator.
    itemsize = jnp.dtype(p1.dtype).itemsize
    block_in = c * rpc * 128 * itemsize
    block_f32 = c * rpc * 128 * 4
    working = 2 * 2 * block_in + 12 * block_f32 + 2 * 8 * 128 * 4
    vmem_limit = int(min(max(2 * working + (2 << 20), 16 << 20), 48 << 20))

    kernel = functools.partial(_consistency_kl_kernel,
                               inv_temperature=1.0 / float(temperature))

    partials = pl.pallas_call(
        kernel,
        out_shape=jax.ShapeDtypeStruct((b, 8, 128), jnp.float32),
        grid=(b, n_chunks),
        in_specs=[in_spec, in_spec],
        out_specs=out_spec,
        compiler_params=pltpu.CompilerParams(
            dimension_semantics=("parallel", "arbitrary"),
            vmem_limit_bytes=vmem_limit),
    )(p1, p2)
    # TODO(synk): for B == 1 on v7x, split the spatial axis across the two TensorCores
    # (leading core-sized grid axis) instead of relying on batch parallelism alone.

    # (kl(p2||p1) + kl(p1||p2)) / 2 with batchmean reduction == sum of partials / (2*B).
    return jnp.sum(partials) / (2.0 * b)


def _reference_consistency_loss(pred1, pred2, temperature=DEFAULT_TEMPERATURE):
    """Pure-JAX mirror of the PyTorch module, for validation."""
    b = pred1.shape[0]
    ls1 = jax.nn.log_softmax(pred1 / temperature, axis=1)
    ls2 = jax.nn.log_softmax(pred2 / temperature, axis=1)
    pr1, pr2 = jnp.exp(ls1), jnp.exp(ls2)
    kl1 = jnp.sum(pr2 * (ls2 - ls1)) / b   # kl_div(log_softmax(p1/T), prob2, batchmean)
    kl2 = jnp.sum(pr1 * (ls1 - ls2)) / b   # kl_div(log_softmax(p2/T), prob1, batchmean)
    return (kl1 + kl2) / 2.0


if __name__ == "__main__":
    key = jax.random.PRNGKey(0)
    k1, k2 = jax.random.split(key, 2)

    B, C, H, W = 2, 4, 16, 16
    pred1 = jax.random.normal(k1, (B, C, H, W), jnp.float32)
    pred2 = jax.random.normal(k2, (B, C, H, W), jnp.float32)

    got = consistency_loss(pred1, pred2, temperature=0.5)
    jax.block_until_ready(got)

    want = _reference_consistency_loss(pred1, pred2, temperature=0.5)
    # Tolerance accounts for the approximate-EUP reciprocal used for the softmax
    # normalization (per perf review) plus f32 summation-order differences.
    assert np.allclose(np.asarray(got), np.asarray(want), rtol=5e-3, atol=1e-3), (
        np.asarray(got), np.asarray(want))

    print("KERNEL_OK")
</pallas_src>

<mosaic_0001>
module attributes {stable_mosaic.version = 11 : i64} {
  func.func @_consistency_kl_kernel(%arg0: i32, %arg1: i32, %arg2: memref<1x4x1x8x128xf32, #tpu.memory_space<vmem>>, %arg3: memref<1x4x1x8x128xf32, #tpu.memory_space<vmem>>, %arg4: memref<1x8x128xf32, #tpu.memory_space<vmem>>) attributes {dimension_semantics = [#tpu.dimension_semantics<parallel>, #tpu.dimension_semantics<arbitrary>], iteration_bounds = array<i64: 2, 1>, scalar_prefetch = 0 : i64, scratch_operands = 0 : i64, tpu.core_type = #tpu.core_type<tc>, window_params = [{transform_indices = @transform_0, window_bounds = array<i64: 1, 4, 1, 8, 128>}, {transform_indices = @transform_1, window_bounds = array<i64: 1, 4, 1, 8, 128>}, {transform_indices = @transform_2, window_bounds = array<i64: 1, 8, 128>}]} {
    %c0_i32 = arith.constant 0 : i32
    %0 = arith.cmpi eq, %arg1, %c0_i32 : i32
    %1 = arith.extui %0 : i1 to i32
    %c0_i32_0 = arith.constant 0 : i32
    %2 = arith.cmpi ne, %1, %c0_i32_0 : i32
    scf.if %2 {
      %cst_23 = arith.constant 0.000000e+00 : f32
      %47 = vector.broadcast %cst_23 : f32 to vector<1x8x128xf32>
      %c0_24 = arith.constant 0 : index
      %c0_25 = arith.constant 0 : index
      %c0_26 = arith.constant 0 : index
      %48 = vector.load %arg4[%c0_24, %c0_25, %c0_26] : memref<1x8x128xf32, #tpu.memory_space<vmem>>, vector<1x8x128xf32>
      tpu.vector_store %arg4[%c0_24, %c0_25, %c0_26], %47 {strides = array<i32>} : memref<1x8x128xf32, #tpu.memory_space<vmem>>, vector<1x8x128xf32>,
    } else {
    }
    %c0 = arith.constant 0 : index
    %c0_1 = arith.constant 0 : index
    %c0_2 = arith.constant 0 : index
    %c0_3 = arith.constant 0 : index
    %c0_4 = arith.constant 0 : index
    %3 = vector.load %arg2[%c0, %c0_1, %c0_2, %c0_3, %c0_4] : memref<1x4x1x8x128xf32, #tpu.memory_space<vmem>>, vector<1x4x1x8x128xf32>
    %4 = vector.shape_cast %3 : vector<1x4x1x8x128xf32> to vector<4x1x8x128xf32>
    %cst = arith.constant 2.000000e+00 : f32
    %5 = vector.broadcast %cst : f32 to vector<4x1x8x128xf32>
    %6 = arith.mulf %4, %5 : vector<4x1x8x128xf32>
    %c0_5 = arith.constant 0 : index
    %c0_6 = arith.constant 0 : index
    %c0_7 = arith.constant 0 : index
    %c0_8 = arith.constant 0 : index
    %c0_9 = arith.constant 0 : index
    %7 = vector.load %arg3[%c0_5, %c0_6, %c0_7, %c0_8, %c0_9] : memref<1x4x1x8x128xf32, #tpu.memory_space<vmem>>, vector<1x4x1x8x128xf32>
    %8 = vector.shape_cast %7 : vector<1x4x1x8x128xf32> to vector<4x1x8x128xf32>
    %cst_10 = arith.constant 2.000000e+00 : f32
    %9 = vector.broadcast %cst_10 : f32 to vector<4x1x8x128xf32>
    %10 = arith.mulf %8, %9 : vector<4x1x8x128xf32>
    %cst_11 = arith.constant dense<0xFF800000> : vector<1x8x128xf32>
    %11 = vector.multi_reduction <maximumf>, %6, %cst_11 [0] : vector<4x1x8x128xf32> to vector<1x8x128xf32>
    %12 = vector.shape_cast %11 : vector<1x8x128xf32> to vector<1x1x8x128xf32>
    %13 = vector.broadcast %12 : vector<1x1x8x128xf32> to vector<4x1x8x128xf32>
    %14 = arith.subf %6, %13 : vector<4x1x8x128xf32>
    %15 = math.exp %14 : vector<4x1x8x128xf32>
    %cst_12 = arith.constant dense<0.000000e+00> : vector<1x8x128xf32>
    %16 = vector.multi_reduction <add>, %15, %cst_12 [0] : vector<4x1x8x128xf32> to vector<1x8x128xf32>
    %17 = vector.shape_cast %16 : vector<1x8x128xf32> to vector<1x1x8x128xf32>
    %cst_13 = arith.constant dense<0xFF800000> : vector<1x8x128xf32>
    %18 = vector.multi_reduction <maximumf>, %10, %cst_13 [0] : vector<4x1x8x128xf32> to vector<1x8x128xf32>
    %19 = vector.shape_cast %18 : vector<1x8x128xf32> to vector<1x1x8x128xf32>
    %20 = vector.broadcast %19 : vector<1x1x8x128xf32> to vector<4x1x8x128xf32>
    %21 = arith.subf %10, %20 : vector<4x1x8x128xf32>
    %22 = math.exp %21 : vector<4x1x8x128xf32>
    %cst_14 = arith.constant dense<0.000000e+00> : vector<1x8x128xf32>
    %23 = vector.multi_reduction <add>, %22, %cst_14 [0] : vector<4x1x8x128xf32> to vector<1x8x128xf32>
    %24 = vector.shape_cast %23 : vector<1x8x128xf32> to vector<1x1x8x128xf32>
    %25 = tpu.reciprocal %17 {approx = true} : vector<1x1x8x128xf32> -> vector<1x1x8x128xf32>
    %26 = vector.broadcast %25 : vector<1x1x8x128xf32> to vector<4x1x8x128xf32>
    %27 = arith.mulf %15, %26 : vector<4x1x8x128xf32>
    %28 = tpu.reciprocal %24 {approx = true} : vector<1x1x8x128xf32> -> vector<1x1x8x128xf32>
    %29 = vector.broadcast %28 : vector<1x1x8x128xf32> to vector<4x1x8x128xf32>
    %30 = arith.mulf %22, %29 : vector<4x1x8x128xf32>
    %31 = arith.subf %6, %10 : vector<4x1x8x128xf32>
    %32 = math.log %17 : vector<1x1x8x128xf32>
    %33 = arith.addf %12, %32 : vector<1x1x8x128xf32>
    %34 = math.log %24 : vector<1x1x8x128xf32>
    %35 = arith.addf %19, %34 : vector<1x1x8x128xf32>
    %36 = arith.subf %33, %35 : vector<1x1x8x128xf32>
    %37 = vector.broadcast %36 : vector<1x1x8x128xf32> to vector<4x1x8x128xf32>
    %38 = arith.subf %31, %37 : vector<4x1x8x128xf32>
    %39 = arith.subf %27, %30 : vector<4x1x8x128xf32>
    %40 = arith.mulf %39, %38 : vector<4x1x8x128xf32>
    %cst_15 = arith.constant dense<0.000000e+00> : vector<1x8x128xf32>
    %41 = vector.multi_reduction <add>, %40, %cst_15 [0] : vector<4x1x8x128xf32> to vector<1x8x128xf32>
    %c0_16 = arith.constant 0 : index
    %c0_17 = arith.constant 0 : index
    %c0_18 = arith.constant 0 : index
    %42 = vector.load %arg4[%c0_16, %c0_17, %c0_18] : memref<1x8x128xf32, #tpu.memory_space<vmem>>, vector<1x8x128xf32>
    %cst_19 = arith.constant dense<0.000000e+00> : vector<8x128xf32>
    %43 = vector.multi_reduction <add>, %41, %cst_19 [0] : vector<1x8x128xf32> to vector<8x128xf32>
    %44 = vector.shape_cast %43 : vector<8x128xf32> to vector<1x8x128xf32>
    %45 = arith.addf %42, %44 : vector<1x8x128xf32>
    %c0_20 = arith.constant 0 : index
    %c0_21 = arith.constant 0 : index
    %c0_22 = arith.constant 0 : index
    %46 = vector.load %arg4[%c0_20, %c0_21, %c0_22] : memref<1x8x128xf32, #tpu.memory_space<vmem>>, vector<1x8x128xf32>
    tpu.vector_store %arg4[%c0_20, %c0_21, %c0_22], %45 {strides = array<i32>} : memref<1x8x128xf32, #tpu.memory_space<vmem>>, vector<1x8x128xf32>,
    return
  }
  func.func @transform_0(%arg0: i32, %arg1: i32) -> (i32, i32, i32, i32, i32) {
    %c0_i32 = arith.constant 0 : i32
    %c0_i32_0 = arith.constant 0 : i32
    %c0_i32_1 = arith.constant 0 : i32
    %c0_i32_2 = arith.constant 0 : i32
    return %arg0, %c0_i32, %arg1, %c0_i32_0, %c0_i32_1 : i32, i32, i32, i32, i32
  }
  func.func @transform_1(%arg0: i32, %arg1: i32) -> (i32, i32, i32, i32, i32) {
    %c0_i32 = arith.constant 0 : i32
    %c0_i32_0 = arith.constant 0 : i32
    %c0_i32_1 = arith.constant 0 : i32
    %c0_i32_2 = arith.constant 0 : i32
    return %arg0, %c0_i32, %arg1, %c0_i32_0, %c0_i32_1 : i32, i32, i32, i32, i32
  }
  func.func @transform_2(%arg0: i32, %arg1: i32) -> (i32, i32, i32) {
    %c0_i32 = arith.constant 0 : i32
    %c0_i32_0 = arith.constant 0 : i32
    %c0_i32_1 = arith.constant 0 : i32
    return %arg0, %c0_i32, %c0_i32_0 : i32, i32, i32
  }
}

</mosaic_0001>

<bundles_post_ra>
// kernel: tpu_custom_call.1
= control target key start
LH: loop header
LB: loop body
LE: loop exit
PB: predicated region body
PF: predicated region fallthrough
CT: control target
= control target key end

     0   :  { %7 = vsyncpa [#allocation3], 0  ;;  %s903_s0 = inlined_call_operand.hbm [shape: f32[2,4,1,8,128], index: 0, kind: input, shape index: {}]   ;;  %s904_s1 = inlined_call_operand.hbm [shape: f32[2,4,1,8,128], index: 1, kind: input, shape index: {}]   ;;  %s905_s2 = inlined_call_operand.hbm [shape: f32[2,8,128], index: 2, kind: output, shape index: {}]  }
   0x1   :  { %9 = vsyncpa [#allocation3 + $0x1], 0 }
   0x2   :  { %10 = vsyncpa [#allocation6], 0 }
   0x3   :  { %12 = vsyncpa [#allocation6 + $0x1], 0 }
   0x4   :  { %13 = vsyncpa [#allocation4], 0 }
   0x5   :  { %15 = vsyncpa [#allocation4 + $0x1], 0  ;;  %s721_s9 = smov 0   ;;  %s723_s10 = smov 0  }
   0x6   :  { %s725_s11 = smov 0   ;;  %s727_s12 = smov 0  }
   0x7   :  { %s729_s13 = smov 0   ;;  %s731_s14 = smov 0  }
   0x8 LB: > { %s442_s15 = sadd.s32 4294967295, %s702_s14   ;;  %s443_s16 = sadd.s32 4294967294, %s702_s14   ;;  %s702_s14 = sphi %s731_s14, %s21_s14   ;;  %s698_s13 = sphi %s729_s13, %s915_s13   ;;  %s694_s12 = sphi %s727_s12, %s914_s12   ;;  %s690_s11 = sphi %s725_s11, %s913_s11   ;;  %s686_s10 = sphi %s723_s10, %s912_s10   ;;  %s682_s9 = sphi %s721_s9, %s911_s9  }
   0x9   : > { %s33_s17 = sadd.s32 1, %s698_s13  ;;  %s42_s18 = sadd.s32 1, %s690_s11 }
   0xa   : > { %p35_p0 = scmp.ge.s32.totalorder %s33_s17, 2  ;;  %p49_p1 = scmp.ne.s32.totalorder %s690_s11, %s686_s10 }
   0xb   : > { %p50_p2 = scmp.eq.s32.totalorder %s702_s14, 0  ;;  %p55_p3 = scmp.ne.s32.totalorder %s686_s10, %s682_s9 }
   0xc   : > { %s917_s17 = smov (%p35_p0, %s33_s17), 0  ;;  %p56_p5 = scmp.eq.s32.totalorder %s442_s15, 0 }
   0xd   : > { %p762_p4 = por %p50_p2, %p49_p1  ;;  %s37_s20 = ssub.s32 %s698_s13, %s917_s17 }
   0xe   : > { %p107_p6 = scmp.eq.s32.totalorder %s442_s15, 1  ;;  %p40_p7 = scmp.eq.s32.totalorder %s37_s20, 0 }
   0xf   : > { %p768_p8 = por %p56_p5, %p55_p3  ;;  %p113_p10 = scmp.eq.s32.totalorder %s443_s16, 1 }
  0x10   : > { %p772_p9 = por %p107_p6, %p49_p1  ;;  %p445_p12 = scmp.ge.s32.totalorder %s702_s14, 2 }
  0x11   : > { %s777_s23 = scalar_select %p40_p7, %s690_s11, %s42_s18  }
  0x12   : > { %p779_p11 = por %p113_p10, %p55_p3  ;;  %p479_p13 = scmp.lt.s32.totalorder %s702_s14, 2 }
  0x13   : > { %s786_s25 = sand.u32 1, %s690_s11   ;;  %s460_s27 = sshll.u32 %s698_s13, 5 }
  0x14   : > { %s446_s26 = sshll.u32 %s786_s25, 5  ;;  %s143_s30 = scalar_lea.hbm %s903_s0, %s460_s27 }
  0x15   : > { %s137_s3 = scalar_lea.vmem [#allocation2], %s446_s26  ;;  %s144_s5 = sshll.u32 %s143_s30, 4  ;;  %s145_s5 = int_to_ptr.hbm [resolvable:$true] %s144_s5 }
  0x16   : > { %s146_s4 = sshll.u32 %s137_s3, 4  ;;  %p795_p0 = pnand %p479_p13, %p762_p4  ;;  %s147_s4 = int_to_ptr.vmem [resolvable:$true] %s146_s4 }
  0x17   : > { %p452_p1 = scmp.ge.s32.totalorder %s702_s14, 1  ;;  %s134_s7 = scalar_lea.sflag [#allocation3], %s786_s25 }
  0x18   : > { %s704_s8 = smov 128   ;;  %s705_s15 = smov 8  }
  0x19   : > { %471 = dma.hbm_to_vmem [thread:$0]  (!%p795_p0), %s145_s5, 512, %s147_s4, %s134_s7, %s704_s8, %s704_s8, %s705_s15  }
  0x1a   : > { %p177_p2 = scmp.lt.s32.totalorder %s702_s14, 3  ;;  %s166_s20 = scalar_lea.hbm %s904_s1, %s460_s27 }
  0x1b   : > { %s167_s28 = sshll.u32 %s166_s20, 4  ;;  %s160_s19 = scalar_lea.vmem [#allocation5], %s446_s26  ;;  %s168_s28 = int_to_ptr.hbm [resolvable:$true] %s167_s28 }
  0x1c   : > { %p178_p3 = pnand %p452_p1, %p177_p2  ;;  %s169_s29 = sshll.u32 %s160_s19, 4  ;;  %s170_s29 = int_to_ptr.vmem [resolvable:$true] %s169_s29 }
  0x1d   : > { %s157_s30 = scalar_lea.sflag [#allocation6], %s786_s25  ;;  %s811_s3 = sand.u32 (!%p178_p3), 1, %s686_s10  }
  0x1e   : > { %474 = dma.hbm_to_vmem [thread:$0]  (!%p795_p0), %s168_s28, 512, %s170_s29, %s157_s30, %s704_s8, %s704_s8, %s705_s15  }
  0x1f   : > { %181 = sbr.rel (%p178_p3) target bundleno = 96 (0x60), region = 28  ;;  %s453_s4 = sshll.u32 (!%p178_p3), %s811_s3, 5 }
  0x20   : > { %s184_s5 = scalar_lea.sflag (!%p178_p3), [#allocation3], %s811_s3  ;;  %s187_s7 = scalar_lea.vmem (!%p178_p3), [#allocation2], %s453_s4 }
  0x24   : > { %669 = dma.done.wait (%p768_p8), %s184_s5, 512  }
  0x25   : > { %671 = vsyncadd (%p768_p8), %s184_s5, 4294966784  ;;  %s194_s25 = scalar_lea.sflag [#allocation6], %s811_s3  ;;  %s197_s26 = scalar_lea.vmem [#allocation5], %s453_s4 }
  0x26   : > { %673 = dma.done.wait (%p768_p8), %s194_s25, 512  }
  0x27   : > { %675 = vsyncadd (%p768_p8), %s194_s25, 4294966784  ;;  %v229_v0 = vld [vmem:[%s187_s7] sm:$0xff]  ;;  %v230_v1 = vld [vmem:[%s187_s7 + $0x8] sm:$0xff]  ;;  %s455_s21 = sshll.u32 %s811_s3, 3  ;;  %s457_s27 = sshll.u32 %s694_s12, 3 }
  0x28   : > { %v231_v2 = vld [vmem:[%s187_s7 + $0x10] sm:$0xff]  ;;  %v232_v3 = vld [vmem:[%s187_s7 + $0x18] sm:$0xff]  ;;  %v824_v4 = vmul.f32 2.0, %v229_v0  ;;  %v826_v5 = vmul.f32 2.0, %v230_v1  ;;  %v237_v7 = vld [vmem:[%s197_s26] sm:$0xff]  ;;  %s332_s15 = scalar_lea.hbm %s905_s2, %s457_s27  ;;  %s223_s16 = scalar_lea.vmem [#allocation7], %s455_s21 }
  0x29   : > { %v828_v6 = vmul.f32 2.0, %v231_v2  ;;  %v238_v8 = vld [vmem:[%s197_s26 + $0x8] sm:$0xff]  ;;  %v830_v9 = vmul.f32 2.0, %v232_v3  ;;  %v239_v10 = vld [vmem:[%s197_s26 + $0x10] sm:$0xff]  ;;  %v240_v11 = vld [vmem:[%s197_s26 + $0x18] sm:$0xff]  ;;  %v832_v12 = vmul.f32 2.0, %v237_v7 }
  0x2a   : > { %v834_v13 = vmul.f32 2.0, %v238_v8  ;;  %v836_v14 = vmul.f32 2.0, %v239_v10  ;;  %v838_v15 = vmul.f32 2.0, %v240_v11  ;;  %v245_v16 = vmax.f32 %v824_v4, %v826_v5  ;;  %s334_s18 = sshll.u32 %s223_s16, 4  ;;  %s336_s20 = sshll.u32 %s332_s15, 4  ;;  %s335_s18 = int_to_ptr.vmem [resolvable:$true] %s334_s18  ;;  %s337_s20 = int_to_ptr.hbm [resolvable:$true] %s336_s20 }
  0x2b   : > { %v246_v17 = vmax.f32 %v828_v6, %v830_v9  ;;  %v291_v3 = vsub.f32 %v824_v4, %v832_v12  ;;  %s322_s28 = scalar_lea.sflag [#allocation4], %s811_s3  ;;  %s630_s12 = sshra.s32 %s337_s20, 4  ;;  %s631_s12 = int_to_ptr.hbm [resolvable:$true] %s630_s12 }
  0x2c   : > { %v263_v18 = vmax.f32 %v832_v12, %v834_v13  ;;  %v264_v19 = vmax.f32 %v836_v14, %v838_v15  ;;  %v292_v7 = vsub.f32 %v826_v5, %v834_v13  ;;  %v293_v8 = vsub.f32 %v828_v6, %v836_v14  ;;  %s632_s19 = scalar_lea.hbm %s631_s12, 8  ;;  %s636_s4 = scalar_lea.hbm %s905_s2, 16 }
  0x2d   : > { %v247_v20 = vmax.f32 %v245_v16, %v246_v17  ;;  %v294_v10 = vsub.f32 %v830_v9, %v838_v15  ;;  %p633_p4 = scmp.ne.s32.totalorder %s631_s12, %s632_s19  ;;  %p637_p7 = scmp.lt.s32.totalorder %s631_s12, %s905_s2 }
  0x2e   : > { %v265_v21 = vmax.f32 %v263_v18, %v264_v19  ;;  %p638_p8 = scmp.lt.s32.totalorder %s636_s4, %s632_s19 }
  0x2f   : > { %v248_v22 = vsub.f32 %v824_v4, %v247_v20  ;;  %v249_v23 = vsub.f32 %v826_v5, %v247_v20  ;;  %v250_v24 = vsub.f32 %v828_v6, %v247_v20  ;;  %v251_v25 = vsub.f32 %v830_v9, %v247_v20  ;;  %p634_p5 = pnand %p633_p4, %p772_p9 }
  0x30   : > { %v266_v26 = vsub.f32 %v832_v12, %v265_v21  ;;  %v267_v27 = vsub.f32 %v834_v13, %v265_v21  ;;  %v268_v31 = vsub.f32 %v836_v14, %v265_v21  ;;  %v269_v33 = vsub.f32 %v838_v15, %v265_v21  ;;  %p639_p10 = por %p638_p8, %p637_p7 }
  0x31   : > { %v252_v28 = vmul.f32 1.442695, %v248_v22  ;;  %v254_v29 = vmul.f32 1.442695, %v249_v23  ;;  %v256_v30 = vmul.f32 1.442695, %v250_v24  ;;  %p635_p6 = pneg %p634_p5 }
  0x32   : > { %v258_v32 = vmul.f32 1.442695, %v251_v25  ;;  %v270_v34 = vmul.f32 1.442695, %v266_v26  ;;  %v272_v35 = vmul.f32 1.442695, %v267_v27 }
  0x33   : > { %532 = vpow2.f32 %v252_v28  ;;  %v274_v36 = vmul.f32 1.442695, %v268_v31  ;;  %v276_v37 = vmul.f32 1.442695, %v269_v33  ;;  %p640_p13 = pnand %p639_p10, %p635_p6 }
  0x34   : > { %534 = vpow2.f32 %v254_v29 }
  0x35   : > { %536 = vpow2.f32 %v256_v30 }
  0x36   : > { %538 = vpow2.f32 %v258_v32 }
  0x37   : > { %540 = vpow2.f32 %v270_v34 }
  0x38   : > { %542 = vpow2.f32 %v272_v35 }
  0x39   : > { %v533_v38 = vpop.eup %532  ;;  %544 = vpow2.f32 %v274_v36 }
  0x3a   : > { %v535_v39 = vpop.eup %534  ;;  %546 = vpow2.f32 %v276_v37 }
  0x3b   : > { %v537_v40 = vpop.eup %536  ;;  %v260_v41 = vadd.f32 %v535_v39, %v533_v38 }
  0x3c   : > { %v539_v42 = vpop.eup %538 }
  0x3d   : > { %v541_v43 = vpop.eup %540  ;;  %v261_v44 = vadd.f32 %v537_v40, %v260_v41 }
  0x3e   : > { %v543_v45 = vpop.eup %542 }
  0x3f   : > { %v545_v46 = vpop.eup %544  ;;  %v262_v47 = vadd.f32 %v539_v42, %v261_v44  ;;  %v278_v48 = vadd.f32 %v543_v45, %v541_v43 }
  0x40   : > { %v547_v49 = vpop.eup %546 }
  0x41   : > { %v279_v50 = vadd.f32 %v545_v46, %v278_v48  ;;  %548 = vlog2.f32 %v262_v47 }
  0x42   : > { %550 = vrcp.f32 %v262_v47 }
  0x43   : > { %v280_v51 = vadd.f32 %v547_v49, %v279_v50 }
  0x45   : > { %552 = vrcp.f32 %v280_v51 }
  0x46   : > { %554 = vlog2.f32 %v280_v51 }
  0x47   : > { %v549_v52 = vpop.eup %548 }
  0x48   : > { %v551_v53 = vpop.eup %550  ;;  %v296_v54 = vmul.f32 0.6931472, %v549_v52 }
  0x49   : > { %v282_v57 = vmul.f32 %v551_v53, %v533_v38  ;;  %v283_v58 = vmul.f32 %v551_v53, %v535_v39  ;;  %v284_v59 = vmul.f32 %v551_v53, %v537_v40  ;;  %v285_v1 = vmul.f32 %v551_v53, %v539_v42 }
  0x4a   : > { %v297_v60 = vadd.f32 %v296_v54, %v247_v20 }
  0x4b   : > { %v553_v55 = vpop.eup %552 }
  0x4c   : > { %v555_v56 = vpop.eup %554  ;;  %v287_v61 = vmul.f32 %v553_v55, %v541_v43  ;;  %v288_v62 = vmul.f32 %v553_v55, %v543_v45  ;;  %v289_v63 = vmul.f32 %v553_v55, %v545_v46  ;;  %v290_v2 = vmul.f32 %v553_v55, %v547_v49 }
  0x4d   : > { %v299_v0 = vmul.f32 0.6931472, %v555_v56 }
  0x4e   : > { %v306_v17 = vsub.f32 %v282_v57, %v287_v61  ;;  %v307_v18 = vsub.f32 %v283_v58, %v288_v62  ;;  %v308_v19 = vsub.f32 %v284_v59, %v289_v63  ;;  %v309_v20 = vsub.f32 %v285_v1, %v290_v2 }
  0x4f   : > { %v300_v11 = vadd.f32 %v299_v0, %v265_v21 }
  0x51   : > { %v301_v16 = vsub.f32 %v297_v60, %v300_v11 }
  0x53   : > { %v302_v22 = vsub.f32 %v291_v3, %v301_v16  ;;  %v303_v23 = vsub.f32 %v292_v7, %v301_v16  ;;  %v304_v24 = vsub.f32 %v293_v8, %v301_v16  ;;  %v305_v25 = vsub.f32 %v294_v10, %v301_v16 }
  0x55   : > { %v310_v4 = vmul.f32 %v306_v17, %v302_v22  ;;  %v311_v5 = vmul.f32 %v307_v18, %v303_v23  ;;  %v312_v12 = vmul.f32 %v308_v19, %v304_v24  ;;  %v313_v6 = vmul.f32 %v309_v20, %v305_v25 }
  0x57   : > { %v314_v13 = vadd.f32 %v311_v5, %v310_v4 }
  0x59   : > { %v315_v9 = vadd.f32 %v314_v13, %v312_v12 }
  0x5b   : > { %v316_v14 = vadd.f32 %v315_v9, %v313_v6 }
  0x5d   : > { %320 = vst [vmem:[%s223_s16] sm:$0xff] %v316_v14 }
  0x5e   : > { %643 = shalt.err (!%p640_p13)
}
  0x5f   : > { %466 = dma.vmem_to_hbm [thread:$0]  (%p772_p9), %s335_s18, 128, %s337_s20, %s322_s28  }
  0x60 PF: > { %s348_s3 = sand.u32 1, %s682_s9   ;;  %p476_p0 = pnand %p445_p12, %p779_p11 }
  0x61   : > { %s349_s25 = scalar_lea.sflag [#allocation4], %s348_s3 }
  0x62   : > { %p477_p1 = pneg %p476_p0 }
  0x64   : > { %677 = dma.done.wait (%p477_p1), %s349_s25, 128  }
  0x65   : > { %679 = vsyncadd (%p477_p1), %s349_s25, 4294967168  ;;  %s21_s14 = sadd.s32 1, %s702_s14   ;;  %s911_s9 = smov %s686_s10 }
  0x66   : > { %p18_p2 = scmp.ge.s32.totalorder %s21_s14, 4   ;;  %s912_s10 = smov %s690_s11 }
  0x67   : > { %s913_s11 = smov %s777_s23  ;;  %s914_s12 = smov %s698_s13 }
  0x68   : > { %s915_s13 = smov %s917_s17  ;;  %20 = sbr.rel (!%p18_p2) target bundleno = 8 (0x8), region = 90 }
  0x6d   :  { %355 = vsyncpa [#allocation3], 1 }
  0x6e   :  { %357 = vsyncpa [#allocation3 + $0x1], 1 }
  0x6f   :  { %358 = vsyncpa [#allocation6], 1 }
  0x70   :  { %360 = vsyncpa [#allocation6 + $0x1], 1 }
  0x71   :  { %361 = vsyncpa [#allocation4], 1 }
  0x72   :  { %363 = vsyncpa [#allocation4 + $0x1], 1 }

</bundles_post_ra>
